<compile_context>
chip_gen: v7x
topology: tpu7x:2x2x1
jax: 0.10.0
libtpu: 0.0.40
codegen_flags: <defaults>
</compile_context>

<pallas_src>
import functools

import jax
import jax.numpy as jnp
from jax.experimental import pallas as pl
from jax.experimental.pallas import tpu as pltpu


def _onehot_embedding_kernel(x_ref, w_ref, out_ref, *, num_feats):
    """Fused one-hot gather: combined bf16 one-hot x block-diagonal bf16 W.

    x_ref  : (bn, F)       int32   -- indices with per-feature vocab offsets added.
    w_ref  : (sumV, Pout)  bfloat16 -- block-diagonal concat of the F tables.
    out_ref: (bn, Pout)    out_dtype -- lane-dense output block (Pout % 128 == 0).
    """
    bn = x_ref.shape[0]
    sum_v = w_ref.shape[0]
    x = x_ref[...]                                              # (bn, F) int32

    # One shared iota; F (static, small) compares OR'd into a single boolean
    # mask, cast ONCE at the end. Offsets make per-feature matches disjoint.
    iota = jax.lax.broadcasted_iota(jnp.int32, (bn, sum_v), 1)
    mask = x[:, 0][:, None] == iota
    for f in range(1, num_feats):
        mask = mask | (x[:, f][:, None] == iota)
    onehot = mask.astype(w_ref.dtype)                           # bf16 0/1, exact

    # Single bf16 MXU matmul with f32 accumulation; one lane-dense full-block
    # store in the caller's dtype.
    acc = jnp.dot(onehot, w_ref[...], preferred_element_type=jnp.float32)
    out_ref[...] = acc.astype(out_ref.dtype)


def make_one_hot_embedding(tables, *, flat=True, block_n=1024, out_dtype=None):
    """Build the fused weight once and return an apply(x) callable.

    :param tables: list of F arrays, tables[i] has shape (one_hot_dims[i], E).
    :param flat: matches the PyTorch module's `flat` flag.
    :param block_n: batch tile (multiple of 128); auto-shrunk for tiny batches.
    :param out_dtype: output dtype (default: dtype of tables[0]).
    :return: apply(x) -> (n, F*E) if flat else (n, F, E).
    """
    num_feats = len(tables)
    embed_dims = [int(t.shape[1]) for t in tables]
    assert min(embed_dims) == max(embed_dims), "equal embed dims required"
    embed_dim = embed_dims[0]
    vocab_sizes = [int(t.shape[0]) for t in tables]
    sum_v = sum(vocab_sizes)
    out_dim = num_feats * embed_dim
    pout = ((out_dim + 127) // 128) * 128          # lane-dense output width
    out_dtype = out_dtype if out_dtype is not None else tables[0].dtype

    # Block-diagonal fused weight in bf16 (0/1 one-hot * bf16 W is exact up to
    # one bf16 rounding of each table value). Built ONCE here, not per call.
    w = jnp.zeros((sum_v, pout), jnp.bfloat16)
    offsets_py = []
    off = 0
    for f in range(num_feats):
        offsets_py.append(off)
        w = w.at[off:off + vocab_sizes[f],
                 f * embed_dim:(f + 1) * embed_dim].set(
                     tables[f].astype(jnp.bfloat16))
        off += vocab_sizes[f]
    offsets = jnp.asarray(offsets_py, jnp.int32)

    kernel = functools.partial(_onehot_embedding_kernel, num_feats=num_feats)

    def apply(x):
        n = x.shape[0]
        assert x.shape[1] == num_feats

        # Keep the grid >= 2 steps when possible (v7x: feed both TensorCores),
        # while not exceeding the requested block_n. Always a multiple of 128.
        eff_bn = block_n
        if n <= block_n:
            eff_bn = min(block_n, max(128, (((n + 1) // 2 + 127) // 128) * 128))

        # Fold per-feature vocab offsets into the indices (trivial XLA add).
        # NOTE: out-of-range / negative indices fail silently (unlike torch
        # nn.Embedding): >= V_f picks up the next table, < 0 yields zeros.
        x_off = x.astype(jnp.int32) + offsets[None, :]

        # Pad batch to a multiple of eff_bn. Padded rows have x_off == 0 which
        # maps to table0[0]; harmless because they are sliced off below.
        grid_n = pl.cdiv(n, eff_bn)
        n_pad = grid_n * eff_bn
        if n_pad != n:
            x_off = jnp.pad(x_off, ((0, n_pad - n), (0, 0)))

        # VMEM budget: single-buffered W + double-buffered x/out + temps.
        out_isz = jnp.dtype(out_dtype).itemsize
        vmem_est = (sum_v * pout * 2                      # W (bf16, 1 buffer)
                    + 2 * eff_bn * num_feats * 4          # x (2 buffers)
                    + 2 * eff_bn * pout * out_isz         # out (2 buffers)
                    + eff_bn * sum_v * 4                  # one-hot temp
                    + eff_bn * pout * 4)                  # f32 acc temp
        vmem_limit = min(48 * 1024 * 1024,                # safe on v7x (64 MiB)
                         max(32 * 1024 * 1024, 2 * vmem_est))

        out_pad = pl.pallas_call(
            kernel,
            out_shape=jax.ShapeDtypeStruct((n_pad, pout), out_dtype),
            grid_spec=pltpu.PrefetchScalarGridSpec(
                num_scalar_prefetch=0,
                grid=(grid_n,),
                in_specs=[
                    pl.BlockSpec((eff_bn, num_feats), lambda i: (i, 0)),
                    # Constant-index weight: single-buffer it (no pipelining
                    # benefit, halves its VMEM footprint).
                    pl.BlockSpec((sum_v, pout), lambda i: (0, 0),
                                 pipeline_mode=pl.Buffered(1)),
                ],
                out_specs=pl.BlockSpec((eff_bn, pout), lambda i: (i, 0)),
            ),
            compiler_params=pltpu.CompilerParams(
                dimension_semantics=("parallel",),   # shard grid across TCs
                vmem_limit_bytes=int(vmem_limit),
            ),
        )(x_off, w)

        out = out_pad[:n, :out_dim]
        if flat:
            # TODO(synk): torch .squeeze() would also drop the batch dim when
            # n == 1; we keep (n, F*E), matching all n > 1 cases.
            return out
        return out.reshape(n, num_feats, embed_dim)

    return apply


def one_hot_embedding(x, tables, *, flat=True, block_n=1024, out_dtype=None):
    """Convenience wrapper (prefer make_one_hot_embedding to cache W)."""
    return make_one_hot_embedding(
        tables, flat=flat, block_n=block_n, out_dtype=out_dtype)(x)


if __name__ == "__main__":
    # Module config (synthetic, deterministic): 3 one-hot features, embed_dim=32.
    one_hot_dims = [16, 24, 32]
    embed_dim = 32
    n = 500  # exercises tail padding; grid auto-shrinks block_n -> 2 steps

    key = jax.random.PRNGKey(0)
    keys = jax.random.split(key, len(one_hot_dims) + 1)
    tables = [
        jax.random.normal(keys[i], (one_hot_dims[i], embed_dim), jnp.float32)
        for i in range(len(one_hot_dims))
    ]
    x = jnp.stack(
        [jax.random.randint(keys[-1], (n,), 0, v, jnp.int32)
         for v in one_hot_dims],
        axis=1,
    )  # (n, F) int32

    embed = make_one_hot_embedding(tables, flat=True)       # W built once
    out = jax.block_until_ready(embed(x))

    # Reference: plain JAX gather on bf16-rounded tables (the kernel's bf16 W
    # path is bit-exact vs this; one bf16 rounding per table value overall).
    tables_bf = [t.astype(jnp.bfloat16).astype(jnp.float32) for t in tables]
    ref = jnp.concatenate(
        [tables_bf[i][x[:, i]] for i in range(len(one_hot_dims))], axis=1)
    ref_f32 = jnp.concatenate(
        [tables[i][x[:, i]] for i in range(len(one_hot_dims))], axis=1)

    assert out.shape == (n, len(one_hot_dims) * embed_dim)
    assert jnp.allclose(out, ref, atol=1e-6), "flat mismatch vs bf16 reference"
    assert jnp.allclose(out, ref_f32, atol=3e-2), "flat mismatch vs f32 reference"

    # Non-flat variant (requires equal embed dims, same as the module).
    embed_nf = make_one_hot_embedding(tables, flat=False)
    out_nf = jax.block_until_ready(embed_nf(x))
    assert out_nf.shape == (n, len(one_hot_dims), embed_dim)
    assert jnp.allclose(
        out_nf, ref.reshape(n, len(one_hot_dims), embed_dim), atol=1e-6)

    print("KERNEL_OK")
</pallas_src>

<mosaic_0001>
module attributes {stable_mosaic.version = 11 : i64} {
  func.func @_onehot_embedding_kernel(%arg0: i32, %arg1: memref<256x3xi32, #tpu.memory_space<vmem>>, %arg2: memref<72x128xbf16, #tpu.memory_space<vmem>>, %arg3: memref<256x128xf32, #tpu.memory_space<vmem>>) attributes {dimension_semantics = [#tpu.dimension_semantics<parallel>], iteration_bounds = array<i64: 2>, scalar_prefetch = 0 : i64, scratch_operands = 0 : i64, tpu.core_type = #tpu.core_type<tc>, window_params = [{transform_indices = @transform_0, window_bounds = array<i64: 256, 3>}, {pipeline_mode = #tpu.pipeline_mode<synchronous>, transform_indices = @transform_1, window_bounds = array<i64: 72, 128>}, {transform_indices = @transform_2, window_bounds = array<i64: 256, 128>}]} {
    %c0 = arith.constant 0 : index
    %c0_0 = arith.constant 0 : index
    %0 = vector.load %arg1[%c0, %c0_0] : memref<256x3xi32, #tpu.memory_space<vmem>>, vector<256x3xi32>
    %1 = tpu.iota {dimensions = array<i32: 1>} : vector<256x72xi32>
    %2 = vector.extract_strided_slice %0 {offsets = [0, 0], sizes = [256, 1], strides = [1, 1]} : vector<256x3xi32> to vector<256x1xi32>
    %3 = vector.shape_cast %2 : vector<256x1xi32> to vector<256xi32>
    %4 = vector.shape_cast %3 : vector<256xi32> to vector<256x1xi32>
    %5 = vector.broadcast %4 : vector<256x1xi32> to vector<256x72xi32>
    %6 = arith.cmpi eq, %5, %1 : vector<256x72xi32>
    %7 = vector.extract_strided_slice %0 {offsets = [0, 1], sizes = [256, 1], strides = [1, 1]} : vector<256x3xi32> to vector<256x1xi32>
    %8 = vector.shape_cast %7 : vector<256x1xi32> to vector<256xi32>
    %9 = vector.shape_cast %8 : vector<256xi32> to vector<256x1xi32>
    %10 = vector.broadcast %9 : vector<256x1xi32> to vector<256x72xi32>
    %11 = arith.cmpi eq, %10, %1 : vector<256x72xi32>
    %12 = arith.ori %6, %11 : vector<256x72xi1>
    %13 = vector.extract_strided_slice %0 {offsets = [0, 2], sizes = [256, 1], strides = [1, 1]} : vector<256x3xi32> to vector<256x1xi32>
    %14 = vector.shape_cast %13 : vector<256x1xi32> to vector<256xi32>
    %15 = vector.shape_cast %14 : vector<256xi32> to vector<256x1xi32>
    %16 = vector.broadcast %15 : vector<256x1xi32> to vector<256x72xi32>
    %17 = arith.cmpi eq, %16, %1 : vector<256x72xi32>
    %18 = arith.ori %12, %17 : vector<256x72xi1>
    %19 = arith.extui %18 : vector<256x72xi1> to vector<256x72xi32>
    %20 = arith.sitofp %19 : vector<256x72xi32> to vector<256x72xf32>
    %21 = arith.truncf %20 : vector<256x72xf32> to vector<256x72xbf16>
    %c0_1 = arith.constant 0 : index
    %c0_2 = arith.constant 0 : index
    %22 = vector.load %arg2[%c0_1, %c0_2] : memref<72x128xbf16, #tpu.memory_space<vmem>>, vector<72x128xbf16>
    %cst = arith.constant dense<0.000000e+00> : vector<256x128xf32>
    %23 = tpu.matmul %21, %22, %cst {dimension_numbers = #tpu.dot_dimension_numbers<[1], [0], [0], [1], [0, 0, 1, 1], [], []>} : vector<256x72xbf16>, vector<72x128xbf16>, vector<256x128xf32> -> vector<256x128xf32>
    %c0_3 = arith.constant 0 : index
    %c0_4 = arith.constant 0 : index
    %24 = vector.load %arg3[%c0_3, %c0_4] : memref<256x128xf32, #tpu.memory_space<vmem>>, vector<256x128xf32>
    tpu.vector_store %arg3[%c0_3, %c0_4], %23 {strides = array<i32>} : memref<256x128xf32, #tpu.memory_space<vmem>>, vector<256x128xf32>,
    return
  }
  func.func @transform_0(%arg0: i32) -> (i32, i32) {
    %c0_i32 = arith.constant 0 : i32
    %c0_i32_0 = arith.constant 0 : i32
    return %arg0, %c0_i32 : i32, i32
  }
  func.func @transform_1(%arg0: i32) -> (i32, i32) {
    %c0_i32 = arith.constant 0 : i32
    %c0_i32_0 = arith.constant 0 : i32
    %c0_i32_1 = arith.constant 0 : i32
    return %c0_i32, %c0_i32_0 : i32, i32
  }
  func.func @transform_2(%arg0: i32) -> (i32, i32) {
    %c0_i32 = arith.constant 0 : i32
    %c0_i32_0 = arith.constant 0 : i32
    return %arg0, %c0_i32 : i32, i32
  }
}

</mosaic_0001>

<bundles_post_ra>
// kernel: tpu_custom_call.1
= control target key start
LH: loop header
LB: loop body
LE: loop exit
PB: predicated region body
PF: predicated region fallthrough
CT: control target
= control target key end

     0   :  { %7 = vsyncpa [#allocation3], 0  ;;  %s1998_s0 = inlined_call_operand.vmem [shape: s32[512,3], index: 0, kind: input, shape index: {}]   ;;  %s1999_s1 = inlined_call_operand.vmem [shape: bf16[72,128], index: 1, kind: input, shape index: {}]   ;;  %s2000_s2 = inlined_call_operand.hbm [shape: f32[512,128], index: 2, kind: output, shape index: {}]  }
   0x1   :  { %9 = vsyncpa [#allocation3 + $0x1], 0  ;;  %s1366_s9 = smov 0   ;;  %s1368_s10 = smov 0  }
   0x2   :  { %s1370_s11 = smov 0   ;;  %s1372_s12 = smov 0  }
   0x3 LB: > { %s1387_s13 = sadd.s32 4294967295, %s1342_s12   ;;  %s1066_s14 = sadd.s32 4294967294, %s1342_s12   ;;  %s1342_s12 = sphi %s1372_s12, %s2018_s12   ;;  %s1338_s11 = sphi %s1370_s11, %s2017_s11   ;;  %s1334_s10 = sphi %s1368_s10, %s2016_s10   ;;  %s1330_s9 = sphi %s1366_s9, %s2015_s9  }
   0x4   : > { %s1391_s15 = sadd.s32 1, %s1342_s12   ;;  %s69_s16 = sadd.s32 1, %s1338_s11 }
   0x5   : > { %s66_s17 = ssub.s32 %s1342_s12, %s1391_s15  ;;  %p79_p0 = scmp.ne.s32.totalorder %s1338_s11, %s1334_s10 }
   0x6   : > { %p67_p1 = scmp.eq.s32.totalorder %s66_s17, 0  ;;  %p80_p2 = scmp.eq.s32.totalorder %s1387_s13, 1 }
   0x7   : > { %p85_p3 = scmp.ne.s32.totalorder %s1334_s10, %s1330_s9  ;;  %p86_p4 = scmp.eq.s32.totalorder %s1066_s14, 1 }
   0x8   : > { %s1402_s18 = scalar_select %p67_p1, %s1338_s11, %s69_s16  }
   0x9   : > { %p1404_p5 = por %p80_p2, %p79_p0  ;;  %p1408_p6 = por %p86_p4, %p85_p3 }
   0xa   : > { %p1069_p7 = scmp.ge.s32.totalorder %s1342_s12, 1  ;;  %p116_p8 = scmp.lt.s32.totalorder %s1342_s12, 3 }
   0xc   : > { %p117_p9 = pnand %p1069_p7, %p116_p8 }
   0xd   : > { %s1071_s21 = sshll.u32 (!%p117_p9), %s1387_s13, 5  ;;  %v1344_v0 = vmov (!%p117_p9), 0   ;;  %v1345_v20 = vmov (!%p117_p9), 1   ;;  %v1346_v28 = vmov (!%p117_p9), 2   ;;  %v1275_v32 = vld [vmem:[%s1999_s1] sm:$0xff] (!%p117_p9)   ;;  %v1276_v33 = vld [vmem:[%s1999_s1 + $0x8] sm:$0xff] (!%p117_p9)  }
   0xe   : > { %120 = sbr.rel (%p117_p9) target bundleno = 631 (0x277), region = 28  ;;  %1253 = vset.pattern.permute.xlu1 (!%p117_p9), %v1344_v0  ;;  %1252 = vset.pattern.permute.xlu0 (!%p117_p9), %v1344_v0  ;;  %p139_p10 = scmp.lt.s32.totalorder (!%p117_p9), %s1071_s21, 63  ;;  %v1277_v34 = vld [vmem:[%s1999_s1 + $0x10] sm:$0xff] (!%p117_p9)   ;;  %v1278_v36 = vld [vmem:[%s1999_s1 + $0x18] sm:$0xff] (!%p117_p9)   ;;  %v1279_v37 = vld [vmem:[%s1999_s1 + $0x20] ss:$0 sps:$4 sm:$0xff] (!%p117_p9)  }
   0xf   : > { %1153 = vmatprep.subr.bf16.mxu0 (!%p117_p9), %v1275_v32  ;;  %1195 = vmatprep.subr.bf16.mxu1 (!%p117_p9), %v1275_v32  ;;  %vm793_vm0 = vcmask (!%p117_p9), 1043456   ;;  %vm2001_vm11 = vcmask (!%p117_p9), 588800   ;;  %s135_s8 = sand.u32 (!%p117_p9), 1, %s1334_s10   ;;  %s1131_s17 = sshll.u32 (!%p117_p9), %s1387_s13, 12 }
  0x10   : > { %1154 = vmatpush3.bf16.msra.mxu0 (!%p117_p9), %v1275_v32  ;;  %1200 = vmatpush3.bf16.msra.mxu1 (!%p117_p9), %v1275_v32  ;;  %v795_v38 = vsel (!%p117_p9), %vm793_vm0, %v1279_v37, 0  ;;  %s1070_s14 = sshll.u32 (!%p117_p9), %s135_s8, 8  ;;  %s1948_s24 = scalar_lea.hbm (!%p117_p9), %s2000_s2, %s1131_s17 }
  0x11   : > { %1155 = vmatprep.subr.bf16.mxu0 (!%p117_p9), %v1276_v33  ;;  %1196 = vmatprep.subr.bf16.mxu1 (!%p117_p9), %v1276_v33  ;;  %s1912_s16 = scalar_lea.vmem (!%p117_p9), [#allocation2], %s1070_s14  ;;  %s1957_s13 = scalar_lea.sflag (!%p117_p9), [#allocation3], %s135_s8 }
  0x12   : > { %s1348_s26 = smov (!%p117_p9), [#allocation2]  }
  0x13   : > { %s1284_s27 = sshll.u32 (!%p117_p9), %s1348_s26, 4  ;;  %s1285_s27 = int_to_ptr.vmem [resolvable:$false] %s1284_s27 }
  0x14   : > { %1156 = vmatpush3.bf16.msra.mxu0 (!%p117_p9), %v1276_v33  ;;  %1201 = vmatpush3.bf16.msra.mxu1 (!%p117_p9), %v1276_v33  ;;  %s1286_s28 = scalar_lea.vmem (!%p117_p9), %s1285_s27, 8192 }
  0x15   : > { %s2020_s21 = smov (!%p139_p10, %s1071_s21), 63  ;;  %1157 = vmatprep.subr.bf16.mxu0 %v1277_v34  ;;  %1197 = vmatprep.subr.bf16.mxu1 %v1277_v34 }
  0x16   : > { %s1072_s22 = sshll.u32 %s2020_s21, 3  ;;  %s1004_s21 = sshll.u32 %s1912_s16, 4  ;;  %s1950_s21 = int_to_ptr.vmem [resolvable:$true] %s1004_s21 }
  0x17   : > { %s1420_s25 = scalar_lea.vmem %s1998_s0, %s1072_s22  ;;  %p1287_p0 = scmp.lt.s32.totalorder %s1950_s21, %s1285_s27 }
  0x18   : > { %v1423_v1 = vld [vmem:[%s1420_s25 + $0x10] sm:$0xff]  ;;  %v1426_v2 = vld [vmem:[%s1420_s25] sm:$0xff]  ;;  %v1431_v3 = vld [vmem:[%s1420_s25 + $0x18] sm:$0xff]  ;;  %1158 = vmatpush3.bf16.msra.mxu0 %v1277_v34  ;;  %1202 = vmatpush3.bf16.msra.mxu1 %v1277_v34 }
  0x19   : > { %187 = vperm.xlu1 %1253, %v1423_v1   ;;  %181 = vperm.xlu0 %1252, %v1426_v2   ;;  %v1434_v4 = vld [vmem:[%s1420_s25 + $0x8] sm:$0xff]  ;;  %v1442_v6 = vld [vmem:[%s1420_s25 + $0x20] sm:$0xff]  ;;  %v1447_v7 = vld [vmem:[%s1420_s25 + $0x38] sm:$0xff] }
  0x1a   : > { %v1439_v5 = vld [vmem:[%s1420_s25 + $0x28] sm:$0xff]  ;;  %v1450_v8 = vld [vmem:[%s1420_s25 + $0x30] sm:$0xff]  ;;  %v1458_v10 = vld [vmem:[%s1420_s25 + $0x40] sm:$0xff]  ;;  %1159 = vmatprep.subr.bf16.mxu0 %v1278_v36  ;;  %1198 = vmatprep.subr.bf16.mxu1 %v1278_v36 }
  0x1b   : > { %v1455_v9 = vld [vmem:[%s1420_s25 + $0x48] sm:$0xff]  ;;  %v1463_v11 = vld [vmem:[%s1420_s25 + $0x58] sm:$0xff]  ;;  %v1466_v12 = vld [vmem:[%s1420_s25 + $0x50] sm:$0xff] }
  0x1c   : > { %v1471_v13 = vld [vmem:[%s1420_s25 + $0x68] sm:$0xff]  ;;  %v1474_v14 = vld [vmem:[%s1420_s25 + $0x60] sm:$0xff]  ;;  %v1479_v15 = vld [vmem:[%s1420_s25 + $0x78] sm:$0xff]  ;;  %1160 = vmatpush3.bf16.msra.mxu0 %v1278_v36  ;;  %1203 = vmatpush3.bf16.msra.mxu1 %v1278_v36 }
  0x1d   : > { %190 = vperm.xlu1 %1253, %v1431_v3   ;;  %184 = vperm.xlu0 %1252, %v1434_v4   ;;  %v1482_v16 = vld [vmem:[%s1420_s25 + $0x70] sm:$0xff]  ;;  %v163_v17 = vld [vmem:[%s1420_s25 + $0x88] sm:$0xff]  ;;  %v162_v18 = vld [vmem:[%s1420_s25 + $0x80] sm:$0xff] }
  0x1e   : > { %v165_v19 = vld [vmem:[%s1420_s25 + $0x98] sm:$0xff]  ;;  %v1492_v21 = vld [vmem:[%s1420_s25 + $0xa0] sm:$0xff]  ;;  %v1496_v22 = vld [vmem:[%s1420_s25 + $0xb0] sm:$0xff]  ;;  %1205 = vmatprep.subr.msk.bf16.mxu0 %vm793_vm0, %v1279_v37  ;;  %1206 = vmatprep.subr.msk.bf16.mxu1 %vm793_vm0, %v1279_v37 }
  0x1f   : > { %v1499_v23 = vld [vmem:[%s1420_s25 + $0x90] sm:$0xff]  ;;  %v1504_v24 = vld [vmem:[%s1420_s25 + $0xc8] sm:$0xff]  ;;  %v1509_v25 = vld [vmem:[%s1420_s25 + $0xd8] sm:$0xff] }
  0x20   : > { %v1515_v26 = vld [vmem:[%s1420_s25 + $0xe0] sm:$0xff]  ;;  %v1520_v27 = vld [vmem:[%s1420_s25 + $0xf0] sm:$0xff]  ;;  %v167_v29 = vld [vmem:[%s1420_s25 + $0xa8] sm:$0xff]  ;;  %1162 = vmatpush3.bf16.msra.mxu0 %v795_v38  ;;  %1204 = vmatpush3.bf16.msra.mxu1 %v795_v38 }
  0x21   : > { %196 = vperm.xlu1 %1253, %v1439_v5   ;;  %193 = vperm.xlu0 %1252, %v1442_v6   ;;  %v1533_v30 = vld [vmem:[%s1420_s25 + $0xc0] sm:$0xff]  ;;  %v1538_v31 = vld [vmem:[%s1420_s25 + $0xd0] sm:$0xff]  ;;  %v169_v35 = vld [vmem:[%s1420_s25 + $0xb8] sm:$0xff] }
  0x22   : > { %v1606_v49 = vld [vmem:[%s1420_s25 + $0xe8] sm:$0xff]  ;;  %v1621_v54 = vld [vmem:[%s1420_s25 + $0xf8] sm:$0xff]  ;;  %s1280_s25 = scalar_lea.vmem %s1950_s21, 4096 }
  0x23   : > { %p1281_p11 = scmp.ne.s32.totalorder %s1950_s21, %s1280_s25  ;;  %p1288_p1 = scmp.lt.s32.totalorder %s1286_s28, %s1280_s25 }
  0x25   : > { %202 = vperm.xlu1 %1253, %v1447_v7   ;;  %199 = vperm.xlu0 %1252, %v1450_v8   ;;  %p1282_p12 = pnand %p1281_p11, %p1404_p5  ;;  %p1289_p2 = por %p1288_p1, %p1287_p0 }
  0x27   : > { %p1283_p13 = pneg %p1282_p12 }
  0x29   : > { %208 = vperm.xlu1 %1253, %v1455_v9   ;;  %205 = vperm.xlu0 %1252, %v1458_v10   ;;  %p1290_p3 = pnand %p1289_p2, %p1283_p13 }
  0x2d   : > { %214 = vperm.xlu1 %1253, %v1463_v11   ;;  %211 = vperm.xlu0 %1252, %v1466_v12  }
  0x31   : > { %220 = vperm.xlu1 %1253, %v1471_v13   ;;  %217 = vperm.xlu0 %1252, %v1474_v14  }
  0x35   : > { %226 = vperm.xlu1 %1253, %v1479_v15   ;;  %223 = vperm.xlu0 %1252, %v1482_v16  }
  0x39   : > { %232 = vperm.xlu1 %1253, %v163_v17   ;;  %229 = vperm.xlu0 %1252, %v162_v18  }
  0x3d   : > { %1254 = vset.pattern.permute.xlu1 %v1345_v20  ;;  %238 = vperm.xlu0 %1252, %v165_v19  }
  0x3e   : > { %312 = vperm.xlu1 %1254, %v1434_v4  }
  0x41   : > { %241 = vperm.xlu0 %1252, %v1492_v21  }
  0x42   : > { %357 = vperm.xlu1 %1254, %v162_v18  }
  0x45   : > { %247 = vperm.xlu0 %1252, %v1496_v22  }
  0x46   : > { %1255 = vset.pattern.permute.xlu1 %v1344_v0 }
  0x47   : > { %235 = vperm.xlu1 %1255, %v1499_v23  }
  0x49   : > { %256 = vperm.xlu0 %1252, %v1504_v24  }
  0x4b   : > { %1256 = vset.pattern.permute.xlu1 %v1345_v20 }
  0x4c   : > { %315 = vperm.xlu1 %1256, %v1423_v1  }
  0x4d   : > { %262 = vperm.xlu0 %1252, %v1509_v25  }
  0x50   : > { %318 = vperm.xlu1 %1256, %v1431_v3  }
  0x51   : > { %265 = vperm.xlu0 %1252, %v1515_v26  }
  0x54   : > { %366 = vperm.xlu1 %1256, %v165_v19  }
  0x55   : > { %271 = vperm.xlu0 %1252, %v1520_v27  }
  0x58   : > { %1257 = vset.pattern.permute.xlu1 %v1346_v28 }
  0x59   : > { %469 = vperm.xlu1 %1257, %v1426_v2   ;;  %1270 = vset.pattern.permute.xlu0 %v1345_v20 }
  0x5a   : > { %309 = vperm.xlu0 %1270, %v1426_v2  }
  0x5d   : > { %517 = vperm.xlu1 %1257, %v162_v18  }
  0x5e   : > { %360 = vperm.xlu0 %1270, %v163_v17  }
  0x61   : > { %520 = vperm.xlu1 %1257, %v163_v17  }
  0x62   : > { %363 = vperm.xlu0 %1270, %v1499_v23  }
  0x65   : > { %478 = vperm.xlu1 %1257, %v1431_v3  }
  0x66   : > { %324 = vperm.xlu0 %1270, %v1439_v5  }
  0x69   : > { %526 = vperm.xlu1 %1257, %v165_v19  }
  0x6a   : > { %330 = vperm.xlu0 %1270, %v1447_v7  }
  0x6d   : > { %1258 = vset.pattern.permute.xlu1 %v1344_v0 }
  0x6e   : > { %244 = vperm.xlu1 %1258, %v167_v29   ;;  %381 = vperm.xlu0 %1270, %v1533_v30  }
  0x72   : > { %1259 = vset.pattern.permute.xlu1 %v1345_v20  ;;  %387 = vperm.xlu0 %1270, %v1538_v31  }
  0x73   : > { %321 = vperm.xlu1 %1259, %v1442_v6  }
  0x76   : > { %348 = vperm.xlu0 %1270, %v1471_v13  }
  0x77   : > { %369 = vperm.xlu1 %1259, %v1492_v21  }
  0x7a   : > { %354 = vperm.xlu0 %1270, %v1479_v15  }
  0x7b   : > { %372 = vperm.xlu1 %1259, %v167_v29  }
  0x7e   : > { %1273 = vset.pattern.permute.xlu0 %v1346_v28 }
  0x7f   : > { %1260 = vset.pattern.permute.xlu1 %v1344_v0  ;;  %472 = vperm.xlu0 %1273, %v1434_v4  }
  0x80   : > { %250 = vperm.xlu1 %1260, %v169_v35  }
  0x83   : > { %475 = vperm.xlu0 %1273, %v1423_v1  }
  0x84   : > { %1261 = vset.pattern.permute.xlu1 %v1345_v20 }
  0x85   : > { %327 = vperm.xlu1 %1261, %v1450_v8  }
  0x87   : > { %523 = vperm.xlu0 %1273, %v1499_v23  }
  0x89   : > { %375 = vperm.xlu1 %1261, %v1496_v22  }
  0x8b   : > { %481 = vperm.xlu0 %1273, %v1442_v6  }
  0x8d   : > { %378 = vperm.xlu1 %1261, %v169_v35  }
  0x8f   : > { %532 = vperm.xlu0 %1273, %v167_v29  }
  0x91   : > { %1262 = vset.pattern.permute.xlu1 %v1346_v28 }
  0x92   : > { %484 = vperm.xlu1 %1262, %v1439_v5  }
  0x93   : > { %490 = vperm.xlu0 %1273, %v1447_v7  }
  0x96   : > { %529 = vperm.xlu1 %1262, %v1492_v21   ;;  %v1347_v21 = vmov 0.0  }
  0x97   : > { %538 = vperm.xlu0 %1273, %v169_v35  }
  0x98   : > { %v1575_v39 = vpop.permute.xlu1 %187  ;;  %v1577_v40 = vpop.permute.xlu0 %181 }
  0x9a   : > { %487 = vperm.xlu1 %1262, %v1450_v8  }
  0x9b   : > { %496 = vperm.xlu0 %1273, %v1455_v9  }
  0x9c   : > { %v1581_v41 = vpop.permute.xlu1 %190  ;;  %v1583_v42 = vpop.permute.xlu0 %184 }
  0x9e   : > { %535 = vperm.xlu1 %1262, %v1496_v22  }
  0x9f   : > { %499 = vperm.xlu0 %1273, %v1466_v12  }
  0xa0   : > { %v1587_v43 = vpop.permute.xlu1 %196  ;;  %v1589_v44 = vpop.permute.xlu0 %193 }
  0xa2   : > { %1263 = vset.pattern.permute.xlu1 %v1344_v0 }
  0xa3   : > { %253 = vperm.xlu1 %1263, %v1533_v30   ;;  %547 = vperm.xlu0 %1273, %v1538_v31  }
  0xa4   : > { %v1594_v45 = vpop.permute.xlu1 %202  ;;  %v1596_v46 = vpop.permute.xlu0 %199 }
  0xa7   : > { %1264 = vset.pattern.permute.xlu1 %v1345_v20  ;;  %505 = vperm.xlu0 %1273, %v1474_v14  }
  0xa8   : > { %v1600_v47 = vpop.permute.xlu1 %208  ;;  %333 = vperm.xlu1 %1264, %v1458_v10   ;;  %v1603_v48 = vpop.permute.xlu0 %205 }
  0xab   : > { %556 = vperm.xlu0 %1273, %v1606_v49  }
  0xac   : > { %v1609_v50 = vpop.permute.xlu1 %214  ;;  %336 = vperm.xlu1 %1264, %v1455_v9   ;;  %v1612_v51 = vpop.permute.xlu0 %211  ;;  %v178_v9 = vlaneseq }
  0xaf   : > { %514 = vperm.xlu0 %1273, %v1479_v15   ;;  %v1664_v15 = vand.u32 127, %v178_v9 }
  0xb0   : > { %v1615_v52 = vpop.permute.xlu1 %220  ;;  %384 = vperm.xlu1 %1264, %v1504_v24   ;;  %v1618_v53 = vpop.permute.xlu0 %217 }
  0xb1   : > { %vm276_vm12 = vcmp.eq.s32.totalorder %v1577_v40, %v1664_v15  ;;  %vm277_vm15 = vcmp.eq.s32.totalorder %v1583_v42, %v1664_v15 }
  0xb3   : > { %562 = vperm.xlu0 %1273, %v1621_v54  }
  0xb4   : > { %v1624_v55 = vpop.permute.xlu1 %226  ;;  %1265 = vset.pattern.permute.xlu1 %v1344_v0  ;;  %v1627_v56 = vpop.permute.xlu0 %223 }
  0xb5   : > { %259 = vperm.xlu1 %1265, %v1538_v31  }
  0xb8   : > { %v233_v57 = vpop.permute.xlu1 %232  ;;  %v230_v58 = vpop.permute.xlu0 %229 }
  0xb9   : > { %1266 = vset.pattern.permute.xlu1 %v1345_v20  ;;  %vm292_vm1 = vcmp.eq.s32.totalorder %v230_v58, %v1664_v15  ;;  %vm293_vm6 = vcmp.eq.s32.totalorder %v233_v57, %v1664_v15 }
  0xba   : > { %339 = vperm.xlu1 %1266, %v1466_v12  }
  0xbc   : > { %v1632_v59 = vpop.permute.xlu0 %238 }
  0xbd   : > { %v1634_v60 = vpop.permute.xlu1 %312 }
  0xbe   : > { %342 = vperm.xlu1 %1266, %v1463_v11   ;;  %vm405_vm0 = vcmp.eq.s32.totalorder %v1634_v60, %v1664_v15 }
  0xc0   : > { %v1637_v61 = vpop.permute.xlu0 %241 }
  0xc1   : > { %v358_v62 = vpop.permute.xlu1 %357 }
  0xc2   : > { %390 = vperm.xlu1 %1266, %v1509_v25   ;;  %vm420_vm2 = vcmp.eq.s32.totalorder %v358_v62, %v1664_v15 }
  0xc3   : > { %vm452_vm5 = vmor %vm292_vm1, %vm420_vm2 }
  0xc4   : > { %v1640_v63 = vpop.permute.xlu0 %247 }
  0xc6   : > { %v1642_v1 = vpop.permute.xlu1 %235  ;;  %1267 = vset.pattern.permute.xlu1 %v1346_v28 }
  0xc7   : > { %493 = vperm.xlu1 %1267, %v1458_v10  }
  0xc8   : > { %v1646_v2 = vpop.permute.xlu0 %256 }
  0xcb   : > { %v1648_v3 = vpop.permute.xlu1 %315  ;;  %541 = vperm.xlu1 %1267, %v1533_v30  }
  0xcc   : > { %v1651_v4 = vpop.permute.xlu0 %262 }
  0xcf   : > { %v1653_v5 = vpop.permute.xlu1 %318  ;;  %544 = vperm.xlu1 %1267, %v1504_v24  }
  0xd0   : > { %v1656_v6 = vpop.permute.xlu0 %265  ;;  %vm407_vm2 = vcmp.eq.s32.totalorder %v1653_v5, %v1664_v15 }
  0xd3   : > { %v1658_v7 = vpop.permute.xlu1 %366  ;;  %502 = vperm.xlu1 %1267, %v1463_v11  }
  0xd4   : > { %v1661_v8 = vpop.permute.xlu0 %271 }
  0xd7   : > { %550 = vperm.xlu1 %1267, %v1509_v25  }
  0xd8   : > { %v470_v10 = vpop.permute.xlu1 %469 }
  0xd9   : > { %v310_v12 = vpop.permute.xlu0 %309  ;;  %vm564_vm1 = vcmp.eq.s32.totalorder %v470_v10, %v1664_v15 }
  0xda   : > { %vm404_vm13 = vcmp.eq.s32.totalorder %v310_v12, %v1664_v15 }
  0xdb   : > { %1268 = vset.pattern.permute.xlu1 %v1344_v0  ;;  %vm436_vm14 = vmor %vm276_vm12, %vm404_vm13  ;;  %vm278_vm12 = vcmp.eq.s32.totalorder %v1575_v39, %v1664_v15  ;;  %vm295_vm13 = vcmp.eq.s32.totalorder %v1632_v59, %v1664_v15 }
  0xdc   : > { %268 = vperm.xlu1 %1268, %v1606_v49   ;;  %v518_v17 = vpop.permute.xlu1 %517 }
  0xdd   : > { %vm580_vm3 = vcmp.eq.s32.totalorder %v518_v17, %v1664_v15  ;;  %v361_v11 = vpop.permute.xlu0 %360 }
  0xde   : > { %vm421_vm4 = vcmp.eq.s32.totalorder %v361_v11, %v1664_v15  ;;  %vm612_vm7 = vmor %vm452_vm5, %vm580_vm3 }
  0xdf   : > { %vm453_vm8 = vmor %vm293_vm6, %vm421_vm4  ;;  %v1089_v22 = vsel %vm612_vm7, 1.0, %v1347_v21  ;;  %vm279_vm7 = vcmp.eq.s32.totalorder %v1581_v41, %v1664_v15 }
  0xe0   : > { %1269 = vset.pattern.permute.xlu1 %v1345_v20  ;;  %v521_v18 = vpop.permute.xlu1 %520  ;;  %vm596_vm3 = vmor %vm436_vm14, %vm564_vm1  ;;  %vm423_vm14 = vcmp.eq.s32.totalorder %v1658_v7, %v1664_v15 }
  0xe1   : > { %vm581_vm9 = vcmp.eq.s32.totalorder %v521_v18, %v1664_v15  ;;  %345 = vperm.xlu1 %1269, %v1474_v14   ;;  %v1676_v19 = vpop.permute.xlu0 %363  ;;  %vm437_vm4 = vmor %vm277_vm15, %vm405_vm0  ;;  %v1073_v40 = vsel %vm596_vm3, 1.0, %v1347_v21 }
  0xe2   : > { %vm613_vm10 = vmor %vm453_vm8, %vm581_vm9  ;;  %vm406_vm8 = vcmp.eq.s32.totalorder %v1648_v3, %v1664_v15  ;;  %vm422_vm3 = vcmp.eq.s32.totalorder %v1676_v19, %v1664_v15 }
  0xe3   : > { %v1090_v23 = vsel %vm613_vm10, 1.0, %v1347_v21  ;;  %vm439_vm10 = vmor %vm279_vm7, %vm407_vm2 }
  0xe4   : > { %v479_v24 = vpop.permute.xlu1 %478  ;;  %v700_v25 = vpack.c.bf16 %v1090_v23, %v1089_v22  ;;  %vm438_vm0 = vmor %vm278_vm12, %vm406_vm8  ;;  %vm280_vm12 = vcmp.eq.s32.totalorder %v1589_v44, %v1664_v15 }
  0xe5   : > { %393 = vperm.xlu1 %1269, %v1515_v26   ;;  %v1681_v29 = vpop.permute.xlu0 %324  ;;  %vm567_vm5 = vcmp.eq.s32.totalorder %v479_v24, %v1664_v15 }
  0xe6   : > { %1179 = vmatprep.mubr.msk.bf16.mxu1 %vm2001_vm11, %v700_v25  ;;  %vm599_vm15 = vmor %vm439_vm10, %vm567_vm5  ;;  %vm294_vm5 = vcmp.eq.s32.totalorder %v1642_v1, %v1664_v15 }
  0xe7   : > { %v1076_v39 = vsel %vm599_vm15, 1.0, %v1347_v21  ;;  %vm454_vm8 = vmor %vm294_vm5, %vm422_vm3  ;;  %vm409_vm15 = vcmp.eq.s32.totalorder %v1681_v29, %v1664_v15 }
  0xe8   : > { %v527_v30 = vpop.permute.xlu1 %526 }
  0xe9   : > { %396 = vperm.xlu1 %1269, %v1606_v49   ;;  %v1685_v14 = vpop.permute.xlu0 %330  ;;  %vm583_vm1 = vcmp.eq.s32.totalorder %v527_v30, %v1664_v15 }
  0xed   : > { %1271 = vset.pattern.permute.xlu1 %v1344_v0  ;;  %v1688_v31 = vpop.permute.xlu1 %244  ;;  %v1690_v32 = vpop.permute.xlu0 %381 }
  0xee   : > { %274 = vperm.xlu1 %1271, %v1621_v54  }
  0xf1   : > { %v1693_v33 = vpop.permute.xlu0 %387 }
  0xf2   : > { %1272 = vset.pattern.permute.xlu1 %v1345_v20  ;;  %v1696_v34 = vpop.permute.xlu1 %321 }
  0xf3   : > { %351 = vperm.xlu1 %1272, %v1482_v16  }
  0xf5   : > { %v1699_v35 = vpop.permute.xlu0 %348 }
  0xf6   : > { %v1701_v36 = vpop.permute.xlu1 %369 }
  0xf7   : > { %399 = vperm.xlu1 %1272, %v1520_v27  }
  0xf9   : > { %v1707_v0 = vpop.permute.xlu0 %354 }
  0xfa   : > { %v1709_v37 = vpop.permute.xlu1 %372 }
  0xfb   : > { %402 = vperm.xlu1 %1272, %v1621_v54  }
  0xfe   : > { %v473_v20 = vpop.permute.xlu0 %472 }
  0xff   : > { %vm565_vm6 = vcmp.eq.s32.totalorder %v473_v20, %v1664_v15  ;;  %1274 = vset.pattern.permute.xlu1 %v1346_v28  ;;  %v1722_v38 = vpop.permute.xlu1 %250 }
 0x100   : > { %vm597_vm9 = vmor %vm437_vm4, %vm565_vm6  ;;  %508 = vperm.xlu1 %1274, %v1471_v13  }
 0x101   : > { %v1074_v42 = vsel %vm597_vm9, 1.0, %v1347_v21  ;;  %vm455_vm6 = vmor %vm295_vm13, %vm423_vm14  ;;  %vm408_vm13 = vcmp.eq.s32.totalorder %v1696_v34, %v1664_v15 }
 0x102   : > { %v476_v28 = vpop.permute.xlu0 %475  ;;  %v692_v41 = vpack.c.bf16 %v1074_v42, %v1073_v40  ;;  %vm615_vm7 = vmor %vm455_vm6, %vm583_vm1  ;;  %vm281_vm1 = vcmp.eq.s32.totalorder %v1587_v43, %v1664_v15 }
 0x103   : > { %vm566_vm2 = vcmp.eq.s32.totalorder %v476_v28, %v1664_v15  ;;  %v1092_v58 = vsel %vm615_vm7, 1.0, %v1347_v21  ;;  %vm297_vm7 = vcmp.eq.s32.totalorder %v1688_v31, %v1664_v15 }
 0x104   : > { %vm598_vm4 = vmor %vm438_vm0, %vm566_vm2  ;;  %553 = vperm.xlu1 %1274, %v1515_v26   ;;  %v1742_v13 = vpop.permute.xlu1 %327  ;;  %1163 = vmatprep.mubr.msk.bf16.mxu0 %vm2001_vm11, %v692_v41  ;;  %vm425_vm2 = vcmp.eq.s32.totalorder %v1709_v37, %v1664_v15 }
 0x105   : > { %v1075_v49 = vsel %vm598_vm4, 1.0, %v1347_v21  ;;  %vm440_vm0 = vmor %vm280_vm12, %vm408_vm13  ;;  %vm296_vm12 = vcmp.eq.s32.totalorder %v1637_v61, %v1664_v15  ;;  %vm411_vm13 = vcmp.eq.s32.totalorder %v1685_v14, %v1664_v15 }
 0x106   : > { %v693_v54 = vpack.c.bf16 %v1076_v39, %v1075_v49  ;;  %v524_v57 = vpop.permute.xlu0 %523  ;;  %vm441_vm4 = vmor %vm281_vm1, %vm409_vm15 }
 0x107   : > { %vm582_vm9 = vcmp.eq.s32.totalorder %v524_v57, %v1664_v15 }
 0x108   : > { %vm614_vm10 = vmor %vm454_vm8, %vm582_vm9  ;;  %511 = vperm.xlu1 %1274, %v1482_v16   ;;  %v1751_v26 = vpop.permute.xlu1 %375  ;;  %1164 = vmatmul.mubr.msk.bf16.vlgmr.msra.gmra.mrb[0].mxu0 %vm2001_vm11, %v693_v54  ;;  %vm424_vm8 = vcmp.eq.s32.totalorder %v1701_v36, %v1664_v15 }
 0x109   : > { %v1091_v59 = vsel %vm614_vm10, 1.0, %v1347_v21  ;;  %vm457_vm10 = vmor %vm297_vm7, %vm425_vm2  ;;  %vm283_vm2 = vcmp.eq.s32.totalorder %v1594_v45, %v1664_v15 }
 0x10a   : > { %v701_v60 = vpack.c.bf16 %v1092_v58, %v1091_v59  ;;  %v482_v62 = vpop.permute.xlu0 %481  ;;  %vm456_vm15 = vmor %vm296_vm12, %vm424_vm8 }
 0x10b   : > { %vm568_vm14 = vcmp.eq.s32.totalorder %v482_v62, %v1664_v15 }
 0x10c   : > { %559 = vperm.xlu1 %1274, %v1520_v27   ;;  %v379_v1 = vpop.permute.xlu1 %378  ;;  %1180 = vmatmul.mubr.msk.bf16.vlgmr.msra.gmra.mrb[0].mxu1 %vm2001_vm11, %v701_v60  ;;  %vm600_vm3 = vmor %vm440_vm0, %vm568_vm14 }
 0x10d   : > { %v1077_v43 = vsel %vm600_vm3, 1.0, %v1347_v21  ;;  %vm410_vm3 = vcmp.eq.s32.totalorder %v1742_v13, %v1664_v15  ;;  %vm427_vm7 = vcmp.eq.s32.totalorder %v379_v1, %v1664_v15 }
 0x10e   : > { %v533_v16 = vpop.permute.xlu0 %532 }
 0x10f   : > { %vm585_vm6 = vcmp.eq.s32.totalorder %v533_v16, %v1664_v15 }
 0x110   : > { %vm617_vm14 = vmor %vm457_vm10, %vm585_vm6  ;;  %vm282_vm6 = vcmp.eq.s32.totalorder %v1596_v46, %v1664_v15 }
 0x111   : > { %v485_v27 = vpop.permute.xlu1 %484  ;;  %v1094_v61 = vsel %vm617_vm14, 1.0, %v1347_v21  ;;  %vm426_vm14 = vcmp.eq.s32.totalorder %v1751_v26, %v1664_v15 }
 0x112   : > { %vm569_vm5 = vcmp.eq.s32.totalorder %v485_v27, %v1664_v15  ;;  %v491_v44 = vpop.permute.xlu0 %490 }
 0x113   : > { %vm601_vm9 = vmor %vm441_vm4, %vm569_vm5  ;;  %vm571_vm0 = vcmp.eq.s32.totalorder %v491_v44, %v1664_v15 }
 0x114   : > { %v1078_v3 = vsel %vm601_vm9, 1.0, %v1347_v21  ;;  %vm443_vm5 = vmor %vm283_vm2, %vm411_vm13  ;;  %vm299_vm13 = vcmp.eq.s32.totalorder %v1722_v38, %v1664_v15 }
 0x115   : > { %v694_v5 = vpack.c.bf16 %v1078_v3, %v1077_v43  ;;  %v530_v7 = vpop.permute.xlu1 %529  ;;  %vm603_vm8 = vmor %vm443_vm5, %vm571_vm0  ;;  %vm298_vm0 = vcmp.eq.s32.totalorder %v1640_v63, %v1664_v15 }
 0x116   : > { %vm584_vm1 = vcmp.eq.s32.totalorder %v530_v7, %v1664_v15  ;;  %v539_v9 = vpop.permute.xlu0 %538  ;;  %vm442_vm9 = vmor %vm282_vm6, %vm410_vm3  ;;  %v1080_v46 = vsel %vm603_vm8, 1.0, %v1347_v21 }
 0x117   : > { %vm616_vm4 = vmor %vm456_vm15, %vm584_vm1  ;;  %1167 = vmatprep.mubr.msk.bf16.mxu0 %vm2001_vm11, %v694_v5  ;;  %vm587_vm10 = vcmp.eq.s32.totalorder %v539_v9, %v1664_v15 }
 0x118   : > { %v1093_v10 = vsel %vm616_vm4, 1.0, %v1347_v21  ;;  %vm459_vm1 = vmor %vm299_vm13, %vm427_vm7  ;;  %vm285_vm7 = vcmp.eq.s32.totalorder %v1600_v47, %v1664_v15 }
 0x119   : > { %v702_v12 = vpack.c.bf16 %v1094_v61, %v1093_v10  ;;  %v488_v45 = vpop.permute.xlu1 %487  ;;  %vm619_vm2 = vmor %vm459_vm1, %vm587_vm10 }
 0x11a   : > { %vm570_vm12 = vcmp.eq.s32.totalorder %v488_v45, %v1664_v15  ;;  %vm458_vm3 = vmor %vm298_vm0, %vm426_vm14  ;;  %v1096_v19 = vsel %vm619_vm2, 1.0, %v1347_v21  ;;  %v497_v36 = vpop.permute.xlu0 %496  ;;  %vm428_vm0 = vcmp.eq.s32.totalorder %v1690_v32, %v1664_v15 }
 0x11b   : > { %vm602_vm15 = vmor %vm442_vm9, %vm570_vm12  ;;  %1183 = vmatprep.mubr.msk.bf16.mxu1 %vm2001_vm11, %v702_v12  ;;  %vm573_vm8 = vcmp.eq.s32.totalorder %v497_v36, %v1664_v15  ;;  %vm284_vm12 = vcmp.eq.s32.totalorder %v1603_v48, %v1664_v15 }
 0x11c   : > { %v1079_v17 = vsel %vm602_vm15, 1.0, %v1347_v21 }
 0x11d   : > { %v695_v11 = vpack.c.bf16 %v1080_v46, %v1079_v17  ;;  %v536_v18 = vpop.permute.xlu1 %535 }
 0x11e   : > { %vm586_vm4 = vcmp.eq.s32.totalorder %v536_v18, %v1664_v15  ;;  %v500_v48 = vpop.permute.xlu0 %499 }
 0x11f   : > { %vm618_vm5 = vmor %vm458_vm3, %vm586_vm4  ;;  %1168 = vmatmul.mubr.msk.bf16.gmra.mrb[4].mxu0 %vm2001_vm11, %v695_v11 }
 0x120   : > { %v1095_v22 = vsel %vm618_vm5, 1.0, %v1347_v21  ;;  %vm301_vm5 = vcmp.eq.s32.totalorder %v1646_v2, %v1664_v15 }
 0x121   : > { %v703_v23 = vpack.c.bf16 %v1096_v19, %v1095_v22 }
 0x122   : > { %v254_v24 = vpop.permute.xlu1 %253  ;;  %v548_v28 = vpop.permute.xlu0 %547 }
 0x123   : > { %1184 = vmatmul.mubr.msk.bf16.gmra.mrb[4].mxu1 %vm2001_vm11, %v703_v23  ;;  %vm300_vm2 = vcmp.eq.s32.totalorder %v254_v24, %v1664_v15 }
 0x126   : > { %v506_v16 = vpop.permute.xlu0 %505 }
 0x127   : > { %v334_v25 = vpop.permute.xlu1 %333 }
 0x128   : > { %vm412_vm10 = vcmp.eq.s32.totalorder %v334_v25, %v1664_v15 }
 0x129   : > { %vm444_vm14 = vmor %vm284_vm12, %vm412_vm10 }
 0x12a   : > { %v557_v44 = vpop.permute.xlu0 %556 }
 0x12b   : > { %v337_v29 = vpop.permute.xlu1 %336 }
 0x12c   : > { %vm413_vm6 = vcmp.eq.s32.totalorder %v337_v29, %v1664_v15 }
 0x12d   : > { %vm445_vm9 = vmor %vm285_vm7, %vm413_vm6 }
 0x12e   : > { %vm605_vm13 = vmor %vm445_vm9, %vm573_vm8  ;;  %vm286_vm9 = vcmp.eq.s32.totalorder %v1612_v51, %v1664_v15 }
 0x12f   : > { %v385_v63 = vpop.permute.xlu1 %384  ;;  %v1082_v47 = vsel %vm605_vm13, 1.0, %v1347_v21  ;;  %vm460_vm6 = vmor %vm300_vm2, %vm428_vm0  ;;  %vm574_vm13 = vcmp.eq.s32.totalorder %v500_v48, %v1664_v15 }
 0x130   : > { %vm429_vm3 = vcmp.eq.s32.totalorder %v385_v63, %v1664_v15 }
 0x131   : > { %vm461_vm8 = vmor %vm301_vm5, %vm429_vm3  ;;  %vm287_vm3 = vcmp.eq.s32.totalorder %v1609_v50, %v1664_v15  ;;  %vm590_vm5 = vcmp.eq.s32.totalorder %v548_v28, %v1664_v15 }
 0x134   : > { %v260_v30 = vpop.permute.xlu1 %259 }
 0x135   : > { %vm302_vm10 = vcmp.eq.s32.totalorder %v260_v30, %v1664_v15 }
 0x139   : > { %v340_v14 = vpop.permute.xlu1 %339 }
 0x13a   : > { %vm414_vm7 = vcmp.eq.s32.totalorder %v340_v14, %v1664_v15 }
 0x13d   : > { %v343_v31 = vpop.permute.xlu1 %342 }
 0x13e   : > { %vm415_vm0 = vcmp.eq.s32.totalorder %v343_v31, %v1664_v15 }
 0x141   : > { %v391_v34 = vpop.permute.xlu1 %390 }
 0x146   : > { %v494_v37 = vpop.permute.xlu1 %493 }
 0x147   : > { %vm572_vm15 = vcmp.eq.s32.totalorder %v494_v37, %v1664_v15 }
 0x148   : > { %vm604_vm1 = vmor %vm444_vm14, %vm572_vm15 }
 0x149   : > { %v1081_v20 = vsel %vm604_vm1, 1.0, %v1347_v21  ;;  %vm446_vm14 = vmor %vm286_vm9, %vm414_vm7  ;;  %vm430_vm1 = vcmp.eq.s32.totalorder %v1693_v33, %v1664_v15 }
 0x14a   : > { %v696_v38 = vpack.c.bf16 %v1082_v47, %v1081_v20  ;;  %v542_v40 = vpop.permute.xlu1 %541 }
 0x14b   : > { %vm588_vm4 = vcmp.eq.s32.totalorder %v542_v40, %v1664_v15 }
 0x14c   : > { %1171 = vmatprep.mubr.msk.bf16.mxu0 %vm2001_vm11, %v696_v38  ;;  %vm620_vm12 = vmor %vm460_vm6, %vm588_vm4 }
 0x14d   : > { %vm1836_vm11 = vmor %vm302_vm10, %vm430_vm1  ;;  %v1097_v51 = vsel %vm620_vm12, 1.0, %v1347_v21  ;;  %vm2006_vm10 = vcmask 588800   ;;  %vm303_vm12 = vcmp.eq.s32.totalorder %v1651_v4, %v1664_v15 }
 0x14e   : > { %v545_v32 = vpop.permute.xlu1 %544  ;;  %vm606_vm4 = vmor %vm446_vm14, %vm574_vm13 }
 0x14f   : > { %vm589_vm15 = vcmp.eq.s32.totalorder %v545_v32, %v1664_v15  ;;  %vm447_vm6 = vmor %vm287_vm3, %vm415_vm0  ;;  %v1083_v33 = vsel %vm606_vm4, 1.0, %v1347_v21  ;;  %vm288_vm3 = vcmp.eq.s32.totalorder %v1618_v53, %v1664_v15  ;;  %vm417_vm4 = vcmp.eq.s32.totalorder %v1699_v35, %v1664_v15  ;;  %v515_v53 = vpop.permute.xlu0 %514 }
 0x150   : > { %vm621_vm2 = vmor %vm461_vm8, %vm589_vm15  ;;  %vm431_vm8 = vcmp.eq.s32.totalorder %v391_v34, %v1664_v15 }
 0x151   : > { %v1098_v42 = vsel %vm621_vm2, 1.0, %v1347_v21  ;;  %vm622_vm13 = vmor %vm1836_vm11, %vm590_vm5 }
 0x152   : > { %v704_v41 = vpack.c.bf16 %v1098_v42, %v1097_v51  ;;  %v503_v13 = vpop.permute.xlu1 %502  ;;  %vm463_vm14 = vmor %vm303_vm12, %vm431_vm8  ;;  %v1099_v54 = vsel %vm622_vm13, 1.0, %v1347_v21 }
 0x153   : > { %vm575_vm7 = vcmp.eq.s32.totalorder %v503_v13, %v1664_v15  ;;  %vm2007_vm0 = vmmov %vm2006_vm10  ;;  %v563_v9 = vpop.permute.xlu0 %562 }
 0x154   : > { %vm607_vm9 = vmor %vm447_vm6, %vm575_vm7  ;;  %1187 = vmatprep.mubr.msk.bf16.mxu1 %vm2006_vm10, %v704_v41  ;;  %vm289_vm6 = vcmp.eq.s32.totalorder %v1615_v52, %v1664_v15  ;;  %vm419_vm10 = vcmp.eq.s32.totalorder %v1707_v0, %v1664_v15 }
 0x155   : > { %v1084_v39 = vsel %vm607_vm9, 1.0, %v1347_v21  ;;  %vm2008_vm2 = vmmov %vm2007_vm0  ;;  %vm576_vm9 = vcmp.eq.s32.totalorder %v506_v16, %v1664_v15 }
 0x156   : > { %v697_v50 = vpack.c.bf16 %v1084_v39, %v1083_v33  ;;  %v551_v49 = vpop.permute.xlu1 %550  ;;  %vm449_vm8 = vmor %vm289_vm6, %vm417_vm4  ;;  %vm304_vm4 = vcmp.eq.s32.totalorder %v1656_v6, %v1664_v15 }
 0x157   : > { %vm591_vm15 = vcmp.eq.s32.totalorder %v551_v49, %v1664_v15 }
 0x158   : > { %vm623_vm1 = vmor %vm463_vm14, %vm591_vm15  ;;  %1172 = vmatmul.mubr.msk.bf16.gmra.mrb[8].mxu0 %vm2007_vm0, %v697_v50 }
 0x159   : > { %v1100_v57 = vsel %vm623_vm1, 1.0, %v1347_v21  ;;  %vm291_vm1 = vcmp.eq.s32.totalorder %v1624_v55, %v1664_v15 }
 0x15a   : > { %v705_v26 = vpack.c.bf16 %v1100_v57, %v1099_v54 }
 0x15b   : > { %v269_v58 = vpop.permute.xlu1 %268 }
 0x15c   : > { %1188 = vmatmul.mubr.msk.bf16.gmra.mrb[8].mxu1 %vm2008_vm2, %v705_v26  ;;  %vm305_vm12 = vcmp.eq.s32.totalorder %v269_v58, %v1664_v15 }
 0x160   : > { %v346_v4 = vpop.permute.xlu1 %345 }
 0x161   : > { %vm416_vm11 = vcmp.eq.s32.totalorder %v346_v4, %v1664_v15 }
 0x162   : > { %vm448_vm5 = vmor %vm288_vm3, %vm416_vm11  ;;  %vm593_vm3 = vcmp.eq.s32.totalorder %v557_v44, %v1664_v15 }
 0x163   : > { %vm608_vm13 = vmor %vm448_vm5, %vm576_vm9  ;;  %vm579_vm5 = vcmp.eq.s32.totalorder %v515_v53, %v1664_v15 }
 0x164   : > { %v394_v59 = vpop.permute.xlu1 %393  ;;  %vm1875_vm11 = vmor %vm291_vm1, %vm419_vm10  ;;  %v1085_v35 = vsel %vm608_vm13, 1.0, %v1347_v21  ;;  %vm290_vm13 = vcmp.eq.s32.totalorder %v1627_v56, %v1664_v15 }
 0x165   : > { %vm432_vm0 = vcmp.eq.s32.totalorder %v394_v59, %v1664_v15  ;;  %vm611_vm1 = vmor %vm1875_vm11, %vm579_vm5  ;;  %vm595_vm11 = vcmp.eq.s32.totalorder %v563_v9, %v1664_v15  ;;  %vm306_vm5 = vcmp.eq.s32.totalorder %v1661_v8, %v1664_v15 }
 0x166   : > { %v1088_v56 = vsel %vm611_vm1, 1.0, %v1347_v21 }
 0x168   : > { %v397_v60 = vpop.permute.xlu1 %396 }
 0x169   : > { %vm433_vm7 = vcmp.eq.s32.totalorder %v397_v60, %v1664_v15 }
 0x16a   : > { %vm465_vm14 = vmor %vm305_vm12, %vm433_vm7 }
 0x16b   : > { %vm625_vm6 = vmor %vm465_vm14, %vm593_vm3 }
 0x16c   : > { %vm464_vm7 = vmor %vm304_vm4, %vm432_vm0  ;;  %v1102_v6 = vsel %vm625_vm6, 1.0, %v1347_v21 }
 0x16d   : > { %v275_v62 = vpop.permute.xlu1 %274 }
 0x16e   : > { %vm307_vm14 = vcmp.eq.s32.totalorder %v275_v62, %v1664_v15 }
 0x172   : > { %v352_v1 = vpop.permute.xlu1 %351 }
 0x176   : > { %v400_v27 = vpop.permute.xlu1 %399 }
 0x177   : > { %vm434_vm4 = vcmp.eq.s32.totalorder %v400_v27, %v1664_v15 }
 0x17a   : > { %v403_v43 = vpop.permute.xlu1 %402 }
 0x17b   : > { %vm435_vm10 = vcmp.eq.s32.totalorder %v403_v43, %v1664_v15 }
 0x17f   : > { %v509_v3 = vpop.permute.xlu1 %508 }
 0x180   : > { %vm577_vm15 = vcmp.eq.s32.totalorder %v509_v3, %v1664_v15 }
 0x181   : > { %vm609_vm2 = vmor %vm449_vm8, %vm577_vm15  ;;  %vm418_vm8 = vcmp.eq.s32.totalorder %v352_v1, %v1664_v15  ;;  %vm2011_vm15 = vcmask 588800  }
 0x182   : > { %v1086_v0 = vsel %vm609_vm2, 1.0, %v1347_v21  ;;  %vm450_vm0 = vmor %vm290_vm13, %vm418_vm8 }
 0x183   : > { %v698_v55 = vpack.c.bf16 %v1086_v0, %v1085_v35  ;;  %v554_v5 = vpop.permute.xlu1 %553  ;;  %vm467_vm2 = vmor %vm307_vm14, %vm435_vm10 }
 0x184   : > { %vm592_vm9 = vcmp.eq.s32.totalorder %v554_v5, %v1664_v15  ;;  %vm627_vm6 = vmor %vm467_vm2, %vm595_vm11 }
 0x185   : > { %vm624_vm12 = vmor %vm464_vm7, %vm592_vm9  ;;  %1175 = vmatprep.mubr.msk.bf16.mxu0 %vm2011_vm15, %v698_v55  ;;  %v1104_v17 = vsel %vm627_vm6, 1.0, %v1347_v21 }
 0x186   : > { %v1101_v7 = vsel %vm624_vm12, 1.0, %v1347_v21  ;;  %vm2012_vm9 = vmmov %vm2011_vm15 }
 0x187   : > { %v706_v61 = vpack.c.bf16 %v1102_v6, %v1101_v7  ;;  %v512_v10 = vpop.permute.xlu1 %511  ;;  %vm466_vm8 = vmor %vm306_vm5, %vm434_vm4 }
 0x188   : > { %vm578_vm3 = vcmp.eq.s32.totalorder %v512_v10, %v1664_v15  ;;  %vm2013_vm15 = vmmov %vm2012_vm9 }
 0x189   : > { %vm610_vm7 = vmor %vm450_vm0, %vm578_vm3  ;;  %1191 = vmatprep.mubr.msk.bf16.mxu1 %vm2012_vm9, %v706_v61 }
 0x18a   : > { %v1087_v12 = vsel %vm610_vm7, 1.0, %v1347_v21  ;;  %vm2014_vm13 = vmmov %vm2012_vm9 }
 0x18b   : > { %v699_v45 = vpack.c.bf16 %v1088_v56, %v1087_v12  ;;  %v560_v46 = vpop.permute.xlu1 %559 }
 0x18c   : > { %vm594_vm10 = vcmp.eq.s32.totalorder %v560_v46, %v1664_v15 }
 0x18d   : > { %vm626_vm12 = vmor %vm466_vm8, %vm594_vm10  ;;  %1176 = vmatmul.mubr.msk.bf16.gmra.mrb[12].mxu0 %vm2013_vm15, %v699_v45 }
 0x18e   : > { %v1103_v11 = vsel %vm626_vm12, 1.0, %v1347_v21 }
 0x18f   : > { %v707_v18 = vpack.c.bf16 %v1104_v17, %v1103_v11 }
 0x191   : > { %1192 = vmatmul.mubr.msk.bf16.gmra.mrb[12].mxu1 %vm2014_vm13, %v707_v18 }
 0x1db   : > { %v1165_v8 = vpop.f32.mrb[0].mxu0 }
 0x1dc   : > { %960 = vst [vmem:[%s1912_s16 + $0x10] sm:$0xff] %v1165_v8  ;;  %v831_v15 = vpop.f32.mrb[1].mxu0 }
 0x1dd   : > { %958 = vst [vmem:[%s1912_s16] sm:$0xff] %v831_v15  ;;  %v1166_v21 = vpop.f32.mrb[2].mxu0 }
 0x1de   : > { %961 = vst [vmem:[%s1912_s16 + $0x18] sm:$0xff] %v1166_v21  ;;  %v834_v19 = vpop.f32.mrb[3].mxu0 }
 0x1df   : > { %959 = vst [vmem:[%s1912_s16 + $0x8] sm:$0xff] %v834_v19  ;;  %v1181_v22 = vpop.f32.mrb[0].mxu1 }
 0x1e0   : > { %976 = vst [vmem:[%s1912_s16 + $0x90] sm:$0xff] %v1181_v22  ;;  %v895_v23 = vpop.f32.mrb[1].mxu1 }
 0x1e1   : > { %974 = vst [vmem:[%s1912_s16 + $0x80] sm:$0xff] %v895_v23  ;;  %v1182_v24 = vpop.f32.mrb[2].mxu1 }
 0x1e2   : > { %977 = vst [vmem:[%s1912_s16 + $0x98] sm:$0xff] %v1182_v24  ;;  %v898_v25 = vpop.f32.mrb[3].mxu1 }
 0x1e3   : > { %975 = vst [vmem:[%s1912_s16 + $0x88] sm:$0xff] %v898_v25 }
 0x1f2   : > { %v1169_v29 = vpop.f32.mrb[4].mxu0 }
 0x1f3   : > { %964 = vst [vmem:[%s1912_s16 + $0x30] sm:$0xff] %v1169_v29  ;;  %v847_v63 = vpop.f32.mrb[5].mxu0 }
 0x1f4   : > { %962 = vst [vmem:[%s1912_s16 + $0x20] sm:$0xff] %v847_v63  ;;  %v1170_v30 = vpop.f32.mrb[6].mxu0 }
 0x1f5   : > { %965 = vst [vmem:[%s1912_s16 + $0x38] sm:$0xff] %v1170_v30  ;;  %v850_v14 = vpop.f32.mrb[7].mxu0 }
 0x1f6   : > { %963 = vst [vmem:[%s1912_s16 + $0x28] sm:$0xff] %v850_v14  ;;  %v1185_v31 = vpop.f32.mrb[4].mxu1 }
 0x1f7   : > { %980 = vst [vmem:[%s1912_s16 + $0xb0] sm:$0xff] %v1185_v31  ;;  %v911_v34 = vpop.f32.mrb[5].mxu1 }
 0x1f8   : > { %978 = vst [vmem:[%s1912_s16 + $0xa0] sm:$0xff] %v911_v34  ;;  %v1186_v36 = vpop.f32.mrb[6].mxu1 }
 0x1f9   : > { %981 = vst [vmem:[%s1912_s16 + $0xb8] sm:$0xff] %v1186_v36  ;;  %v914_v37 = vpop.f32.mrb[7].mxu1 }
 0x1fa   : > { %979 = vst [vmem:[%s1912_s16 + $0xa8] sm:$0xff] %v914_v37 }
 0x22b   : > { %v1173_v47 = vpop.f32.mrb[8].mxu0 }
 0x22c   : > { %968 = vst [vmem:[%s1912_s16 + $0x50] sm:$0xff] %v1173_v47  ;;  %v863_v20 = vpop.f32.mrb[9].mxu0 }
 0x22d   : > { %966 = vst [vmem:[%s1912_s16 + $0x40] sm:$0xff] %v863_v20  ;;  %v1174_v38 = vpop.f32.mrb[10].mxu0 }
 0x22e   : > { %969 = vst [vmem:[%s1912_s16 + $0x58] sm:$0xff] %v1174_v38  ;;  %v866_v40 = vpop.f32.mrb[11].mxu0 }
 0x22f   : > { %967 = vst [vmem:[%s1912_s16 + $0x48] sm:$0xff] %v866_v40  ;;  %v1189_v48 = vpop.f32.mrb[8].mxu1 }
 0x230   : > { %984 = vst [vmem:[%s1912_s16 + $0xd0] sm:$0xff] %v1189_v48  ;;  %v927_v32 = vpop.f32.mrb[9].mxu1 }
 0x231   : > { %982 = vst [vmem:[%s1912_s16 + $0xc0] sm:$0xff] %v927_v32  ;;  %v1190_v2 = vpop.f32.mrb[10].mxu1 }
 0x232   : > { %985 = vst [vmem:[%s1912_s16 + $0xd8] sm:$0xff] %v1190_v2  ;;  %v930_v51 = vpop.f32.mrb[11].mxu1 }
 0x233   : > { %983 = vst [vmem:[%s1912_s16 + $0xc8] sm:$0xff] %v930_v51 }
 0x260   : > { %v1177_v42 = vpop.f32.mrb[12].mxu0 }
 0x261   : > { %972 = vst [vmem:[%s1912_s16 + $0x70] sm:$0xff] %v1177_v42  ;;  %v879_v28 = vpop.f32.mrb[13].mxu0 }
 0x262   : > { %970 = vst [vmem:[%s1912_s16 + $0x60] sm:$0xff] %v879_v28  ;;  %v1178_v41 = vpop.f32.mrb[14].mxu0 }
 0x263   : > { %973 = vst [vmem:[%s1912_s16 + $0x78] sm:$0xff] %v1178_v41  ;;  %v882_v13 = vpop.f32.mrb[15].mxu0 }
 0x264   : > { %971 = vst [vmem:[%s1912_s16 + $0x68] sm:$0xff] %v882_v13  ;;  %v1193_v33 = vpop.f32.mrb[12].mxu1 }
 0x265   : > { %988 = vst [vmem:[%s1912_s16 + $0xf0] sm:$0xff] %v1193_v33  ;;  %v943_v39 = vpop.f32.mrb[13].mxu1 }
 0x266   : > { %986 = vst [vmem:[%s1912_s16 + $0xe0] sm:$0xff] %v943_v39  ;;  %v1194_v50 = vpop.f32.mrb[14].mxu1 }
 0x267   : > { %989 = vst [vmem:[%s1912_s16 + $0xf8] sm:$0xff] %v1194_v50  ;;  %v946_v49 = vpop.f32.mrb[15].mxu1 }
 0x268   : > { %987 = vst [vmem:[%s1912_s16 + $0xe8] sm:$0xff] %v946_v49 }
 0x269   : > { %1293 = shalt.err (!%p1290_p3)
}
 0x26a   : > { %s1294_s29 = scalar_lea.hbm %s1948_s24, 4096  ;;  %s1298_s4 = scalar_lea.hbm %s2000_s2, 8192 }
 0x26b   : > { %p1295_p4 = scmp.ne.s32.totalorder %s1948_s24, %s1294_s29  ;;  %p1299_p9 = scmp.lt.u32.totalorder %s1948_s24, %s2000_s2 }
 0x26c   : > { %p1300_p10 = scmp.lt.u32.totalorder %s1298_s4, %s1294_s29  ;;  %p1302_p12 = scmp.lt.u32.totalorder %s1294_s29, %s1948_s24 }
 0x26d   : > { %p1296_p7 = pnand %p1295_p4, %p1404_p5 }
 0x26e   : > { %p1301_p11 = por %p1300_p10, %p1299_p9 }
 0x26f   : > { %p1297_p8 = pneg %p1296_p7 }
 0x270   : > { %p1303_p13 = por %p1302_p12, %p1301_p11 }
 0x272   : > { %p1304_p0 = pnand %p1303_p13, %p1297_p8 }
 0x274   : > { %1307 = shalt.err (!%p1304_p0)
}
 0x275   : > { %s1349_s7 = smov 128   ;;  %s1350_s8 = smov 8  }
 0x276   : > { %1207 = dma.vmem_to_hbm [thread:$0]  (%p1404_p5), %s1950_s21, 4096, %s1948_s24, %s1957_s13, %s1349_s7, %s1349_s7, %s1350_s8  }
 0x277 PF: > { %p1213_p1 = scmp.ge.s32.totalorder %s1342_s12, 2  ;;  %s1019_s14 = sand.u32 1, %s1330_s9  }
 0x278   : > { %s1020_s16 = scalar_lea.sflag [#allocation3], %s1019_s14 }
 0x279   : > { %p1210_p2 = pnand %p1213_p1, %p1408_p6 }
 0x27b   : > { %1325 = dma.done.wait (!%p1210_p2), %s1020_s16, 4096  }
 0x27c   : > { %1327 = vsyncadd (!%p1210_p2), %s1020_s16, 4294963200  ;;  %p12_p3 = scmp.ge.s32.totalorder %s1391_s15, 4   ;;  %s2015_s9 = smov %s1334_s10 }
 0x27d   : > { %s2016_s10 = smov %s1338_s11  ;;  %s2017_s11 = smov %s1402_s18 }
 0x27e   : > { %s2018_s12 = smov %s1391_s15  ;;  %14 = sbr.rel (!%p12_p3) target bundleno = 3 (0x3), region = 63 }
 0x285   :  { %1025 = vsyncpa [#allocation3], 1 }
 0x286   :  { %1027 = vsyncpa [#allocation3 + $0x1], 1 }

</bundles_post_ra>
